<compile_context>
chip_gen: v7x
topology: tpu7x:2x2x1
jax: 0.10.0
libtpu: 0.0.40
codegen_flags: <defaults>
</compile_context>

<pallas_src>
import functools

import jax
import jax.numpy as jnp
from jax import lax
from jax.experimental import pallas as pl
from jax.experimental.pallas import tpu as pltpu

_LANE = 128
_MAX_TILE_ROWS = 1024   # (1024,128) f32 tile = 512 KiB per input per buffer
_N_CORES = 2            # leading "parallel" grid axis (v7x has 2 TCs)


def _tobit_kernel(*refs, C, two_w, has_weight, n_elems, tile_rows, tiles_per_core):
    if has_weight:
        var_ref, sr_ref, ss_ref, tr_ref, ts_ref, w_ref, out_ref, acc_ref = refs
    else:
        var_ref, sr_ref, ss_ref, tr_ref, ts_ref, out_ref, acc_ref = refs
        w_ref = None

    c = pl.program_id(0)   # "parallel" core axis
    i = pl.program_id(1)   # "arbitrary" reduction axis over tiles

    @pl.when(i == 0)
    def _():
        acc_ref[...] = jnp.zeros_like(acc_ref)

    v = var_ref[...].astype(jnp.float32)
    sr = sr_ref[...].astype(jnp.float32)
    ss = ss_ref[...].astype(jnp.float32)
    tr = tr_ref[...].astype(jnp.float32)
    ts = ts_ref[...].astype(jnp.float32)

    if has_weight:
        tr_eff = tr * w_ref[...].astype(jnp.float32)
    else:
        tr_eff = tr

    # val_mle + val_var in the s*(s - 2t) form (one fewer vector multiply).
    val_mle_var = sr * (sr - jnp.float32(two_w) * tr_eff) + jnp.float32(C) * v
    sig = 1.0 / (1.0 + jnp.exp(-ss))                       # F.sigmoid
    val_unsel = jnp.log(1.0 - sig + jnp.float32(1e-8))
    elem = ts * val_mle_var - (1.0 - ts) * val_unsel

    # Mask everything beyond the true (unpadded) element count: the last tile
    # may overhang, and the second core's range may be entirely past the array
    # (its block index was clamped in the index_map).
    row = lax.broadcasted_iota(jnp.int32, elem.shape, 0)
    lane = lax.broadcasted_iota(jnp.int32, elem.shape, 1)
    base_row = (c * tiles_per_core + i) * tile_rows
    gidx = (base_row + row) * _LANE + lane
    elem = jnp.where(gidx < n_elems, elem, 0.0)

    # Vector accumulate into an (8,128) vreg-shaped VMEM accumulator (VALU only).
    acc_ref[...] += jnp.sum(elem.reshape(tile_rows // 8, 8, _LANE), axis=0)

    @pl.when(i == pl.num_programs(1) - 1)
    def _():
        out_ref[0] = acc_ref[...]


def tobit_mle_loss2(var_r, score_r, score_s, target_r, target_s,
                    weight=None, C=5):
    """Pallas implementation of Tobit_MLELoss2.forward. Returns an f32 scalar."""
    shape = var_r.shape
    assert score_r.shape == shape and score_s.shape == shape
    assert target_r.shape == shape and target_s.shape == shape
    n_elems = int(var_r.size)
    assert n_elems > 0

    # Scalar weight folds into a constant; only per-element weights are streamed.
    weight_arr = None
    two_w = 2.0
    if weight is not None:
        w = jnp.asarray(weight)
        if int(w.size) == 1:
            two_w = 2.0 * float(w.reshape(()))
        else:
            weight_arr = jnp.broadcast_to(w, shape)

    pad = (-n_elems) % _LANE

    def prep(x):
        flat = jnp.reshape(x, (-1,))            # free for contiguous inputs
        if pad:
            flat = jnp.pad(flat, (0, pad))      # only for ragged numel (rare)
        return flat.reshape(-1, _LANE)          # native dtype; cast in-kernel

    inputs = [prep(var_r), prep(score_r), prep(score_s),
              prep(target_r), prep(target_s)]
    if weight_arr is not None:
        inputs.append(prep(weight_arr))

    n_rows = (n_elems + pad) // _LANE
    tile_rows = min(_MAX_TILE_ROWS, ((n_rows + 7) // 8) * 8)
    total_tiles = -(-n_rows // tile_rows)
    tiles_per_core = -(-total_tiles // _N_CORES)
    grid = (_N_CORES, tiles_per_core)

    def in_map(c, i):
        # Clamp so no fully out-of-bounds DMA is issued; the in-kernel mask
        # zeroes contributions from clamped / overhanging positions.
        return (jnp.minimum(c * tiles_per_core + i, total_tiles - 1), 0)

    tile_spec = pl.BlockSpec((tile_rows, _LANE), in_map)
    in_specs = [tile_spec] * len(inputs)

    kernel = functools.partial(
        _tobit_kernel, C=float(C), two_w=two_w,
        has_weight=weight_arr is not None,
        n_elems=n_elems, tile_rows=tile_rows, tiles_per_core=tiles_per_core)

    bytes_in = sum(int(x.size) * x.dtype.itemsize for x in inputs)
    cost = pl.CostEstimate(
        flops=12 * n_elems,
        transcendentals=2 * n_elems,                       # exp + log
        bytes_accessed=bytes_in + _N_CORES * 8 * _LANE * 4)

    partials = pl.pallas_call(
        kernel,
        out_shape=jax.ShapeDtypeStruct((_N_CORES, 8, _LANE), jnp.float32),
        grid_spec=pltpu.PrefetchScalarGridSpec(
            num_scalar_prefetch=0,
            grid=grid,
            in_specs=in_specs,
            out_specs=pl.BlockSpec((1, 8, _LANE), lambda c, i: (c, 0, 0)),
            scratch_shapes=[pltpu.VMEM((8, _LANE), jnp.float32)],
        ),
        compiler_params=pltpu.CompilerParams(
            dimension_semantics=("parallel", "arbitrary")),
        cost_estimate=cost,
    )(*inputs)

    # Single final reduction + mean, done once outside the grid loop.
    return jnp.sum(partials) / jnp.float32(n_elems)


def _ref_loss(var_r, score_r, score_s, target_r, target_s, weight=None, C=5):
    if weight is not None:
        val_mle = jnp.square(score_r) - 2.0 * (target_r * weight) * score_r
    else:
        val_mle = jnp.square(score_r) - 2.0 * target_r * score_r
    val_var = C * var_r
    val_unsel = jnp.log(1.0 - jax.nn.sigmoid(score_s) + 1e-8)
    return jnp.mean(target_s * val_mle + target_s * val_var
                    - (1.0 - target_s) * val_unsel)


if __name__ == "__main__":
    key = jax.random.PRNGKey(0)
    k1, k2, k3, k4, k5, k6 = jax.random.split(key, 6)

    shape = (2, 4, 16, 16)  # NCHW-style elementwise inputs
    var_r = jax.random.uniform(k1, shape, dtype=jnp.float32)              # variances >= 0
    score_r = jax.random.normal(k2, shape, dtype=jnp.float32)
    score_s = jax.random.normal(k3, shape, dtype=jnp.float32)
    target_r = jax.random.normal(k4, shape, dtype=jnp.float32)
    target_s = jax.random.bernoulli(k5, 0.5, shape).astype(jnp.float32)   # selection mask
    C = 5

    # weight=None branch (module default)
    loss = jax.block_until_ready(
        tobit_mle_loss2(var_r, score_r, score_s, target_r, target_s, C=C))
    ref = _ref_loss(var_r, score_r, score_s, target_r, target_s, None, C)
    assert jnp.allclose(loss, ref, rtol=1e-4, atol=1e-5), (loss, ref)

    # scalar weight -> folded into a compile-time constant (no extra HBM stream)
    loss_ws = jax.block_until_ready(
        tobit_mle_loss2(var_r, score_r, score_s, target_r, target_s, weight=0.5, C=C))
    ref_ws = _ref_loss(var_r, score_r, score_s, target_r, target_s, 0.5, C)
    assert jnp.allclose(loss_ws, ref_ws, rtol=1e-4, atol=1e-5), (loss_ws, ref_ws)

    # per-element weight tensor -> streamed as a 6th input
    w_t = jax.random.uniform(k6, shape, dtype=jnp.float32)
    loss_wt = jax.block_until_ready(
        tobit_mle_loss2(var_r, score_r, score_s, target_r, target_s, weight=w_t, C=C))
    ref_wt = _ref_loss(var_r, score_r, score_s, target_r, target_s, w_t, C)
    assert jnp.allclose(loss_wt, ref_wt, rtol=1e-4, atol=1e-5), (loss_wt, ref_wt)

    print("KERNEL_OK")
</pallas_src>

<mosaic_0001>
module attributes {stable_mosaic.version = 11 : i64} {
  func.func @_tobit_kernel(%arg0: i32, %arg1: i32, %arg2: memref<16x128xf32, #tpu.memory_space<vmem>>, %arg3: memref<16x128xf32, #tpu.memory_space<vmem>>, %arg4: memref<16x128xf32, #tpu.memory_space<vmem>>, %arg5: memref<16x128xf32, #tpu.memory_space<vmem>>, %arg6: memref<16x128xf32, #tpu.memory_space<vmem>>, %arg7: memref<1x8x128xf32, #tpu.memory_space<vmem>>, %arg8: memref<8x128xf32, #tpu.memory_space<vmem>>) attributes {dimension_semantics = [#tpu.dimension_semantics<parallel>, #tpu.dimension_semantics<arbitrary>], iteration_bounds = array<i64: 2, 1>, scalar_prefetch = 0 : i64, scratch_operands = 1 : i64, tpu.core_type = #tpu.core_type<tc>, window_params = [{transform_indices = @transform_0, window_bounds = array<i64: 16, 128>}, {transform_indices = @transform_1, window_bounds = array<i64: 16, 128>}, {transform_indices = @transform_2, window_bounds = array<i64: 16, 128>}, {transform_indices = @transform_3, window_bounds = array<i64: 16, 128>}, {transform_indices = @transform_4, window_bounds = array<i64: 16, 128>}, {transform_indices = @transform_5, window_bounds = array<i64: 1, 8, 128>}]} {
    %c0_i32 = arith.constant 0 : i32
    %0 = arith.cmpi eq, %arg1, %c0_i32 : i32
    %1 = arith.extui %0 : i1 to i32
    %c0_i32_0 = arith.constant 0 : i32
    %2 = arith.cmpi ne, %1, %c0_i32_0 : i32
    scf.if %2 {
      %cst_25 = arith.constant 0.000000e+00 : f32
      %54 = vector.broadcast %cst_25 : f32 to vector<8x128xf32>
      %c0_26 = arith.constant 0 : index
      %c0_27 = arith.constant 0 : index
      %55 = vector.load %arg8[%c0_26, %c0_27] : memref<8x128xf32, #tpu.memory_space<vmem>>, vector<8x128xf32>
      tpu.vector_store %arg8[%c0_26, %c0_27], %54 {strides = array<i32>} : memref<8x128xf32, #tpu.memory_space<vmem>>, vector<8x128xf32>,
    } else {
    }
    %c0 = arith.constant 0 : index
    %c0_1 = arith.constant 0 : index
    %3 = vector.load %arg2[%c0, %c0_1] : memref<16x128xf32, #tpu.memory_space<vmem>>, vector<16x128xf32>
    %c0_2 = arith.constant 0 : index
    %c0_3 = arith.constant 0 : index
    %4 = vector.load %arg3[%c0_2, %c0_3] : memref<16x128xf32, #tpu.memory_space<vmem>>, vector<16x128xf32>
    %c0_4 = arith.constant 0 : index
    %c0_5 = arith.constant 0 : index
    %5 = vector.load %arg4[%c0_4, %c0_5] : memref<16x128xf32, #tpu.memory_space<vmem>>, vector<16x128xf32>
    %c0_6 = arith.constant 0 : index
    %c0_7 = arith.constant 0 : index
    %6 = vector.load %arg5[%c0_6, %c0_7] : memref<16x128xf32, #tpu.memory_space<vmem>>, vector<16x128xf32>
    %c0_8 = arith.constant 0 : index
    %c0_9 = arith.constant 0 : index
    %7 = vector.load %arg6[%c0_8, %c0_9] : memref<16x128xf32, #tpu.memory_space<vmem>>, vector<16x128xf32>
    %cst = arith.constant 2.000000e+00 : f32
    %8 = vector.broadcast %cst : f32 to vector<16x128xf32>
    %9 = arith.mulf %8, %6 : vector<16x128xf32>
    %10 = arith.subf %4, %9 : vector<16x128xf32>
    %11 = arith.mulf %4, %10 : vector<16x128xf32>
    %cst_10 = arith.constant 5.000000e+00 : f32
    %12 = vector.broadcast %cst_10 : f32 to vector<16x128xf32>
    %13 = arith.mulf %12, %3 : vector<16x128xf32>
    %14 = arith.addf %11, %13 : vector<16x128xf32>
    %cst_11 = arith.constant 0.000000e+00 : f32
    %15 = vector.broadcast %cst_11 : f32 to vector<16x128xf32>
    %16 = arith.subf %15, %5 : vector<16x128xf32>
    %17 = math.exp %16 : vector<16x128xf32>
    %cst_12 = arith.constant 1.000000e+00 : f32
    %18 = vector.broadcast %cst_12 : f32 to vector<16x128xf32>
    %19 = arith.addf %18, %17 : vector<16x128xf32>
    %cst_13 = arith.constant 1.000000e+00 : f32
    %20 = vector.broadcast %cst_13 : f32 to vector<16x128xf32>
    %21 = arith.divf %20, %19 : vector<16x128xf32>
    %cst_14 = arith.constant 1.000000e+00 : f32
    %22 = vector.broadcast %cst_14 : f32 to vector<16x128xf32>
    %23 = arith.subf %22, %21 : vector<16x128xf32>
    %cst_15 = arith.constant 9.99999993E-9 : f32
    %24 = vector.broadcast %cst_15 : f32 to vector<16x128xf32>
    %25 = arith.addf %23, %24 : vector<16x128xf32>
    %26 = math.log %25 : vector<16x128xf32>
    %27 = arith.mulf %7, %14 : vector<16x128xf32>
    %cst_16 = arith.constant 1.000000e+00 : f32
    %28 = vector.broadcast %cst_16 : f32 to vector<16x128xf32>
    %29 = arith.subf %28, %7 : vector<16x128xf32>
    %30 = arith.mulf %29, %26 : vector<16x128xf32>
    %31 = arith.subf %27, %30 : vector<16x128xf32>
    %32 = tpu.iota {dimensions = array<i32: 0>} : vector<16x128xi32>
    %33 = tpu.iota {dimensions = array<i32: 1>} : vector<16x128xi32>
    %c1_i32 = arith.constant 1 : i32
    %34 = arith.muli %arg0, %c1_i32 : i32
    %35 = arith.addi %34, %arg1 : i32
    %c16_i32 = arith.constant 16 : i32
    %36 = arith.muli %35, %c16_i32 : i32
    %37 = vector.broadcast %36 : i32 to vector<16x128xi32>
    %38 = arith.addi %37, %32 : vector<16x128xi32>
    %c128_i32 = arith.constant 128 : i32
    %39 = vector.broadcast %c128_i32 : i32 to vector<16x128xi32>
    %40 = arith.muli %38, %39 : vector<16x128xi32>
    %41 = arith.addi %40, %33 : vector<16x128xi32>
    %c2048_i32 = arith.constant 2048 : i32
    %42 = vector.broadcast %c2048_i32 : i32 to vector<16x128xi32>
    %43 = arith.cmpi slt, %41, %42 : vector<16x128xi32>
    %cst_17 = arith.constant 0.000000e+00 : f32
    %44 = vector.broadcast %cst_17 : f32 to vector<16x128xf32>
    %45 = arith.select %43, %31, %44 : vector<16x128xi1>, vector<16x128xf32>
    %c0_18 = arith.constant 0 : index
    %c0_19 = arith.constant 0 : index
    %46 = vector.load %arg8[%c0_18, %c0_19] : memref<8x128xf32, #tpu.memory_space<vmem>>, vector<8x128xf32>
    %47 = vector.shape_cast %45 : vector<16x128xf32> to vector<2x8x128xf32>
    %cst_20 = arith.constant dense<0.000000e+00> : vector<8x128xf32>
    %48 = vector.multi_reduction <add>, %47, %cst_20 [0] : vector<2x8x128xf32> to vector<8x128xf32>
    %49 = arith.addf %46, %48 : vector<8x128xf32>
    %c0_21 = arith.constant 0 : index
    %c0_22 = arith.constant 0 : index
    %50 = vector.load %arg8[%c0_21, %c0_22] : memref<8x128xf32, #tpu.memory_space<vmem>>, vector<8x128xf32>
    tpu.vector_store %arg8[%c0_21, %c0_22], %49 {strides = array<i32>} : memref<8x128xf32, #tpu.memory_space<vmem>>, vector<8x128xf32>,
    %c0_i32_23 = arith.constant 0 : i32
    %51 = arith.cmpi eq, %arg1, %c0_i32_23 : i32
    %52 = arith.extui %51 : i1 to i32
    %c0_i32_24 = arith.constant 0 : i32
    %53 = arith.cmpi ne, %52, %c0_i32_24 : i32
    scf.if %53 {
      %c0_25 = arith.constant 0 : index
      %c0_26 = arith.constant 0 : index
      %54 = vector.load %arg8[%c0_25, %c0_26] : memref<8x128xf32, #tpu.memory_space<vmem>>, vector<8x128xf32>
      %c0_27 = arith.constant 0 : index
      %c0_28 = arith.constant 0 : index
      %c0_29 = arith.constant 0 : index
      %55 = vector.load %arg7[%c0_27, %c0_28, %c0_29] : memref<1x8x128xf32, #tpu.memory_space<vmem>>, vector<1x8x128xf32>
      %56 = vector.shape_cast %55 : vector<1x8x128xf32> to vector<8x128xf32>
      %57 = vector.shape_cast %54 : vector<8x128xf32> to vector<1x8x128xf32>
      tpu.vector_store %arg7[%c0_27, %c0_28, %c0_29], %57 {strides = array<i32>} : memref<1x8x128xf32, #tpu.memory_space<vmem>>, vector<1x8x128xf32>,
    } else {
    }
    return
  }
  func.func @transform_0(%arg0: i32, %arg1: i32) -> (i32, i32) {
    %c1_i32 = arith.constant 1 : i32
    %0 = arith.muli %arg0, %c1_i32 : i32
    %1 = arith.addi %0, %arg1 : i32
    %c0_i32 = arith.constant 0 : i32
    %2 = arith.minsi %1, %c0_i32 : i32
    %c0_i32_0 = arith.constant 0 : i32
    %c0_i32_1 = arith.constant 0 : i32
    return %2, %c0_i32_0 : i32, i32
  }
  func.func @transform_1(%arg0: i32, %arg1: i32) -> (i32, i32) {
    %c1_i32 = arith.constant 1 : i32
    %0 = arith.muli %arg0, %c1_i32 : i32
    %1 = arith.addi %0, %arg1 : i32
    %c0_i32 = arith.constant 0 : i32
    %2 = arith.minsi %1, %c0_i32 : i32
    %c0_i32_0 = arith.constant 0 : i32
    %c0_i32_1 = arith.constant 0 : i32
    return %2, %c0_i32_0 : i32, i32
  }
  func.func @transform_2(%arg0: i32, %arg1: i32) -> (i32, i32) {
    %c1_i32 = arith.constant 1 : i32
    %0 = arith.muli %arg0, %c1_i32 : i32
    %1 = arith.addi %0, %arg1 : i32
    %c0_i32 = arith.constant 0 : i32
    %2 = arith.minsi %1, %c0_i32 : i32
    %c0_i32_0 = arith.constant 0 : i32
    %c0_i32_1 = arith.constant 0 : i32
    return %2, %c0_i32_0 : i32, i32
  }
  func.func @transform_3(%arg0: i32, %arg1: i32) -> (i32, i32) {
    %c1_i32 = arith.constant 1 : i32
    %0 = arith.muli %arg0, %c1_i32 : i32
    %1 = arith.addi %0, %arg1 : i32
    %c0_i32 = arith.constant 0 : i32
    %2 = arith.minsi %1, %c0_i32 : i32
    %c0_i32_0 = arith.constant 0 : i32
    %c0_i32_1 = arith.constant 0 : i32
    return %2, %c0_i32_0 : i32, i32
  }
  func.func @transform_4(%arg0: i32, %arg1: i32) -> (i32, i32) {
    %c1_i32 = arith.constant 1 : i32
    %0 = arith.muli %arg0, %c1_i32 : i32
    %1 = arith.addi %0, %arg1 : i32
    %c0_i32 = arith.constant 0 : i32
    %2 = arith.minsi %1, %c0_i32 : i32
    %c0_i32_0 = arith.constant 0 : i32
    %c0_i32_1 = arith.constant 0 : i32
    return %2, %c0_i32_0 : i32, i32
  }
  func.func @transform_5(%arg0: i32, %arg1: i32) -> (i32, i32, i32) {
    %c0_i32 = arith.constant 0 : i32
    %c0_i32_0 = arith.constant 0 : i32
    %c0_i32_1 = arith.constant 0 : i32
    return %arg0, %c0_i32, %c0_i32_0 : i32, i32, i32
  }
}

</mosaic_0001>

<bundles_post_ra>
// kernel: tpu_custom_call.1
= control target key start
LH: loop header
LB: loop body
LE: loop exit
PB: predicated region body
PF: predicated region fallthrough
CT: control target
= control target key end

     0   :  { %s1507_s0 = inlined_call_operand.hbm [shape: f32[16,128], index: 0, kind: input, shape index: {}]   ;;  %s1508_s1 = inlined_call_operand.hbm [shape: f32[16,128], index: 1, kind: input, shape index: {}]   ;;  %s1509_s2 = inlined_call_operand.hbm [shape: f32[16,128], index: 2, kind: input, shape index: {}]   ;;  %s1510_s3 = inlined_call_operand.hbm [shape: f32[16,128], index: 3, kind: input, shape index: {}]   ;;  %s1511_s4 = inlined_call_operand.hbm [shape: f32[16,128], index: 4, kind: input, shape index: {}]   ;;  %s1512_s5 = inlined_call_operand.hbm [shape: f32[2,8,128], index: 5, kind: output, shape index: {}]  }
   0x1   :  { %1522 = sst [smem:[#allocation23_spill]] %s1508_s1 }
   0x2   :  { %10 = vsyncpa [#allocation4], 0 }
   0x3   :  { %12 = vsyncpa [#allocation4 + $0x1], 0 }
   0x4   :  { %13 = vsyncpa [#allocation7], 0 }
   0x5   :  { %15 = vsyncpa [#allocation7 + $0x1], 0 }
   0x6   :  { %16 = vsyncpa [#allocation10], 0 }
   0x7   :  { %18 = vsyncpa [#allocation10 + $0x1], 0 }
   0x8   :  { %19 = vsyncpa [#allocation5], 0 }
   0x9   :  { %21 = vsyncpa [#allocation5 + $0x1], 0  ;;  %s1189_s18 = smov 0   ;;  %s1191_s19 = smov 0  }
   0xa   :  { %s1193_s20 = smov 0   ;;  %s1195_s21 = smov 0  }
   0xb   :  { %s1197_s22 = smov 0   ;;  %s1199_s23 = smov 0  }
   0xc   :  { %s1201_s24 = smov 0   ;;  %s1203_s25 = smov 0  }
   0xd LB: > { %1523 = sst [smem:[#allocation17_spill]] %s1121_s18  ;;  %s1228_s26 = sadd.s32 4294967295, %s1149_s25   ;;  %s1149_s25 = sphi %s1203_s25, %s27_s25   ;;  %s1145_s24 = sphi %s1201_s24, %s1552_s24   ;;  %s1141_s23 = sphi %s1199_s23, %s1551_s23   ;;  %s1137_s22 = sphi %s1197_s22, %s1497_s22   ;;  %s1133_s21 = sphi %s1195_s21, %s1555_s21   ;;  %s1129_s20 = sphi %s1193_s20, %s1550_s20   ;;  %s1125_s19 = sphi %s1191_s19, %s1554_s19   ;;  %s1121_s18 = sphi %s1189_s18, %s1553_s18  }
   0xe   : > { %1524 = sst [smem:[#allocation18_spill]] %s1129_s20  ;;  %s733_s27 = sadd.s32 4294967294, %s1149_s25  }
   0xf   : > { %1525 = sst [smem:[#allocation19_spill]] %s1145_s24  ;;  %s39_s28 = sadd.s32 1, %s1145_s24 }
  0x10   : > { %p41_p0 = scmp.ge.s32.totalorder %s39_s28, 2  ;;  %p1118_p1 = scmp.ne.s32.totalorder %s1137_s22, 0 }
  0x11   : > { %p60_p2 = scmp.eq.s32.totalorder %s1149_s25, 0  ;;  %p65_p3 = scmp.ne.s32.totalorder %s1137_s22, %s1133_s21 }
  0x12   : > { %s1557_s28 = smov (%p41_p0, %s39_s28), 0  ;;  %p66_p5 = scmp.eq.s32.totalorder %s1228_s26, 0 }
  0x13   : > { %1526 = sst [smem:[#allocation20_spill]] %s1557_s28  ;;  %p1237_p4 = por %p1118_p1, %p60_p2 }
  0x14   : > { %p1242_p6 = por %p66_p5, %p65_p3  ;;  %s203_s6 = ssub.s32 %s1145_s24, %s1557_s28 }
  0x15   : > { %p204_p7 = scmp.eq.s32.totalorder %s203_s6, 0  ;;  %s206_s7 = sadd.s32 1, %s1129_s20 }
  0x16   : > { %s1528_s30 = scalar_select %p1242_p6, 1, 0 }
  0x17   : > { %s1250_s8 = scalar_select %p204_p7, %s1129_s20, %s206_s7  }
  0x18   : > { %p216_p8 = scmp.ne.s32.totalorder %s1129_s20, %s1125_s19  ;;  %p217_p9 = scmp.eq.s32.totalorder %s1228_s26, 1 }
  0x19   : > { %1529 = sst [smem:[#allocation21_spill]] %s1250_s8  ;;  %p222_p10 = scmp.ne.s32.totalorder %s1125_s19, %s1121_s18 }
  0x1a   : > { %p223_p11 = scmp.eq.s32.totalorder %s733_s27, 1  ;;  %p1257_p12 = por %p217_p9, %p216_p8 }
  0x1b   : > { %p800_p1 = scmp.lt.s32.totalorder %s1149_s25, 2  ;;  %s267_s12 = sand.u32 1, %s1149_s25  }
  0x1c   : > { %s1530_s9 = scalar_select %p1257_p12, 1, 0 }
  0x1d   : > { %p1262_p0 = por %p223_p11, %p222_p10  ;;  %p1269_p2 = pnand %p800_p1, %p1237_p4 }
  0x1e   : > { %s1151_s13 = smov [#allocation6]   ;;  %s1279_s15 = scalar_lea.sflag [#allocation7], %s267_s12 }
  0x1f   : > { %s1531_s10 = scalar_select %p1262_p0, 1, 0 }
  0x20   : > { %s1533_s11 = scalar_select %p1269_p2, 1, 0 }
  0x21   : > { %1532 = sst [smem:[#allocation22_spill]] %s1531_s10  ;;  %s281_s14 = sshll.u32 %s1151_s13, 4  ;;  %s1274_s14 = int_to_ptr.vmem [resolvable:$true] %s281_s14 }
  0x22   : > { %s1534_s1 = sld [smem:[#allocation23_spill]]  ;;  %p1289_p5 = pneg %p1269_p2 }
  0x28   : > { %s888_s21 = scalar_lea.hbm %s1534_s1, 256 }
  0x29   : > { %p889_p4 = scmp.ne.s32.totalorder %s1534_s1, %s888_s21  ;;  %p895_p9 = scmp.lt.u32.totalorder %s888_s21, %s888_s21 }
  0x2a   : > { %p897_p10 = scmp.lt.u32.totalorder %s888_s21, %s1534_s1 }
  0x2b   : > { %p891_p7 = pnand %p1289_p5, %p889_p4 }
  0x2c   : > { %p898_p11 = por %p897_p10, %p895_p9 }
  0x2d   : > { %p892_p8 = pneg %p891_p7 }
  0x2f   : > { %p899_p1 = pnand %p898_p11, %p892_p8 }
  0x31   : > { %902 = shalt.err (!%p899_p1)
}
  0x32   : > { %s903_s16 = scalar_lea.vmem %s1274_s14, 256  ;;  %s910_s17 = scalar_lea.vmem %s1274_s14, 512 }
  0x33   : > { %p904_p13 = scmp.ne.s32.totalorder %s1274_s14, %s903_s16  ;;  %p911_p4 = scmp.lt.s32.totalorder %s1274_s14, %s1274_s14 }
  0x34   : > { %p912_p7 = scmp.lt.s32.totalorder %s910_s17, %s903_s16 }
  0x35   : > { %p906_p3 = pnand %p904_p13, %p1289_p5 }
  0x36   : > { %p913_p12 = por %p912_p7, %p911_p4 }
  0x37   : > { %p907_p0 = pneg %p906_p3 }
  0x39   : > { %p914_p6 = pnand %p913_p12, %p907_p0 }
  0x3b   : > { %917 = shalt.err (!%p914_p6)
}
  0x3c   : > { %s1152_s21 = smov 128   ;;  %s1153_s27 = smov 8  }
  0x3d   : > { %786 = dma.hbm_to_vmem [thread:$0]  (!%p1269_p2), %s1534_s1, 256, %s1274_s14, %s1279_s15, %s1152_s21, %s1152_s21, %s1153_s27  }
  0x3e   : > { %p361_p13 = scmp.lt.s32.totalorder %s1149_s25, 3  ;;  %p1536_p12 = scmp.ge.s32.totalorder %s1149_s25, 1 }
  0x3f   : > { %s1154_s16 = smov [#allocation9]   ;;  %s1324_s28 = scalar_lea.sflag [#allocation10], %s267_s12 }
  0x40   : > { %p1318_p6 = pnand %p1536_p12, %p361_p13  ;;  %s329_s17 = sshll.u32 %s1154_s16, 4  ;;  %s330_s17 = int_to_ptr.vmem [resolvable:$true] %s329_s17 }
  0x41   : > { %s918_s20 = scalar_lea.hbm %s1510_s3, 256 }
  0x42   : > { %s1537_s13 = scalar_select %p1318_p6, 1, 0 }
  0x43   : > { %p919_p0 = scmp.ne.s32.totalorder %s1510_s3, %s918_s20  ;;  %p925_p9 = scmp.lt.u32.totalorder %s918_s20, %s918_s20 }
  0x44   : > { %p927_p10 = scmp.lt.u32.totalorder %s918_s20, %s1510_s3 }
  0x45   : > { %p921_p3 = pnand %p919_p0, %p1289_p5 }
  0x46   : > { %p928_p11 = por %p927_p10, %p925_p9 }
  0x47   : > { %p922_p8 = pneg %p921_p3 }
  0x49   : > { %p929_p1 = pnand %p928_p11, %p922_p8 }
  0x4b   : > { %932 = shalt.err (!%p929_p1)
}
  0x4c   : > { %s933_s12 = scalar_lea.vmem %s330_s17, 256  ;;  %s940_s24 = scalar_lea.vmem %s330_s17, 512 }
  0x4d   : > { %p934_p4 = scmp.ne.s32.totalorder %s330_s17, %s933_s12  ;;  %p941_p12 = scmp.lt.s32.totalorder %s330_s17, %s330_s17 }
  0x4e   : > { %p942_p6 = scmp.lt.s32.totalorder %s940_s24, %s933_s12 }
  0x4f   : > { %p936_p7 = pnand %p934_p4, %p1289_p5 }
  0x50   : > { %p943_p2 = por %p942_p6, %p941_p12 }
  0x51   : > { %p937_p13 = pneg %p936_p7 }
  0x53   : > { %p944_p0 = pnand %p943_p2, %p937_p13 }
  0x55   : > { %947 = shalt.err (!%p944_p0)
}
  0x56   : > { %p1538_p3 = scmp.ne.s32.totalorder %s1533_s11, 0  ;;  %s1155_s8 = smov [#allocation3]  }
  0x57   : > { %s257_s10 = sshll.u32 %s1155_s8, 4  ;;  %s948_s14 = scalar_lea.hbm %s1507_s0, 256  ;;  %s258_s10 = int_to_ptr.vmem [resolvable:$true] %s257_s10 }
  0x58   : > { %792 = dma.hbm_to_vmem [thread:$0]  (!%p1538_p3), %s1510_s3, 256, %s330_s17, %s1324_s28, %s1152_s21, %s1152_s21, %s1153_s27  }
  0x59   : > { %p949_p2 = scmp.ne.s32.totalorder %s1507_s0, %s948_s14  ;;  %p955_p9 = scmp.lt.u32.totalorder %s948_s14, %s948_s14 }
  0x5a   : > { %p957_p10 = scmp.lt.u32.totalorder %s948_s14, %s1507_s0 }
  0x5b   : > { %p951_p6 = pnand %p949_p2, %p1289_p5 }
  0x5c   : > { %p958_p11 = por %p957_p10, %p955_p9 }
  0x5d   : > { %p952_p8 = pneg %p951_p6 }
  0x5f   : > { %p959_p1 = pnand %p958_p11, %p952_p8 }
  0x61   : > { %962 = shalt.err (!%p959_p1)
}
  0x62   : > { %s963_s17 = scalar_lea.vmem %s258_s10, 256  ;;  %s970_s18 = scalar_lea.vmem %s258_s10, 512 }
  0x63   : > { %p964_p4 = scmp.ne.s32.totalorder %s258_s10, %s963_s17  ;;  %p971_p12 = scmp.lt.s32.totalorder %s258_s10, %s258_s10 }
  0x64   : > { %p972_p0 = scmp.lt.s32.totalorder %s970_s18, %s963_s17 }
  0x65   : > { %p966_p7 = pnand %p964_p4, %p1289_p5 }
  0x66   : > { %p973_p3 = por %p972_p0, %p971_p12 }
  0x67   : > { %p967_p13 = pneg %p966_p7 }
  0x69   : > { %p974_p2 = pnand %p973_p3, %p967_p13 }
  0x6b   : > { %977 = shalt.err (!%p974_p2)
}
  0x6c   : > { %p1539_p6 = scmp.ne.s32.totalorder %s1533_s11, 0  ;;  %s1156_s8 = smov [#allocation8]  }
  0x6d   : > { %s305_s7 = sshll.u32 %s1156_s8, 4  ;;  %s978_s29 = scalar_lea.hbm %s1509_s2, 256  ;;  %s306_s7 = int_to_ptr.vmem [resolvable:$true] %s305_s7 }
  0x6e   : > { %783 = dma.hbm_to_vmem [thread:$0]  (!%p1539_p6), %s1507_s0, 256, %s258_s10, [#allocation4], %s1152_s21, %s1152_s21, %s1153_s27  }
  0x6f   : > { %p979_p3 = scmp.ne.s32.totalorder %s1509_s2, %s978_s29  ;;  %p985_p10 = scmp.lt.u32.totalorder %s978_s29, %s978_s29 }
  0x70   : > { %p987_p11 = scmp.lt.u32.totalorder %s978_s29, %s1509_s2 }
  0x71   : > { %p981_p8 = pnand %p979_p3, %p1289_p5 }
  0x72   : > { %p988_p1 = por %p987_p11, %p985_p10 }
  0x73   : > { %p982_p9 = pneg %p981_p8 }
  0x75   : > { %p989_p4 = pnand %p988_p1, %p982_p9 }
  0x77   : > { %992 = shalt.err (!%p989_p4)
}
  0x78   : > { %s993_s10 = scalar_lea.vmem %s306_s7, 256  ;;  %s1000_s1 = scalar_lea.vmem %s306_s7, 512 }
  0x79   : > { %p994_p7 = scmp.ne.s32.totalorder %s306_s7, %s993_s10  ;;  %p1001_p0 = scmp.lt.s32.totalorder %s306_s7, %s306_s7 }
  0x7a   : > { %p1002_p2 = scmp.lt.s32.totalorder %s1000_s1, %s993_s10 }
  0x7b   : > { %p996_p13 = pnand %p994_p7, %p1289_p5 }
  0x7c   : > { %p1003_p6 = por %p1002_p2, %p1001_p0 }
  0x7d   : > { %p997_p12 = pneg %p996_p13 }
  0x7f   : > { %p1004_p3 = pnand %p1003_p6, %p997_p12 }
  0x81   : > { %1007 = shalt.err (!%p1004_p3)
}
  0x82   : > { %p1540_p8 = scmp.ne.s32.totalorder %s1533_s11, 0  ;;  %s1157_s16 = smov [#allocation11]  }
  0x83   : > { %s353_s14 = sshll.u32 %s1157_s16, 4  ;;  %s1008_s24 = scalar_lea.hbm %s1511_s4, 256  ;;  %s354_s14 = int_to_ptr.vmem [resolvable:$true] %s353_s14 }
  0x84   : > { %789 = dma.hbm_to_vmem [thread:$0]  (!%p1540_p8), %s1509_s2, 256, %s306_s7, %s1279_s15, %s1152_s21, %s1152_s21, %s1153_s27  }
  0x85   : > { %p1009_p6 = scmp.ne.s32.totalorder %s1511_s4, %s1008_s24  ;;  %p1015_p11 = scmp.lt.u32.totalorder %s1008_s24, %s1008_s24 }
  0x86   : > { %p1017_p1 = scmp.lt.u32.totalorder %s1008_s24, %s1511_s4 }
  0x87   : > { %p1011_p9 = pnand %p1009_p6, %p1289_p5 }
  0x88   : > { %p1018_p4 = por %p1017_p1, %p1015_p11 }
  0x89   : > { %p1012_p10 = pneg %p1011_p9 }
  0x8b   : > { %p1019_p7 = pnand %p1018_p4, %p1012_p10 }
  0x8d   : > { %1022 = shalt.err (!%p1019_p7)
}
  0x8e   : > { %s1023_s15 = scalar_lea.vmem %s354_s14, 256  ;;  %s1030_s7 = scalar_lea.vmem %s354_s14, 512 }
  0x8f   : > { %p1024_p13 = scmp.ne.s32.totalorder %s354_s14, %s1023_s15  ;;  %p1031_p2 = scmp.lt.s32.totalorder %s354_s14, %s354_s14 }
  0x90   : > { %p1032_p3 = scmp.lt.s32.totalorder %s1030_s7, %s1023_s15 }
  0x91   : > { %p1026_p12 = pnand %p1024_p13, %p1289_p5 }
  0x92   : > { %p1033_p8 = por %p1032_p3, %p1031_p2 }
  0x93   : > { %p1027_p0 = pneg %p1026_p12 }
  0x95   : > { %p1034_p6 = pnand %p1033_p8, %p1027_p0 }
  0x97   : > { %1037 = shalt.err (!%p1034_p6)
}
  0x98   : > { %p1541_p9 = scmp.ne.s32.totalorder %s1533_s11, 0  ;;  %p1542_p10 = scmp.ne.s32.totalorder %s1537_s13, 0 }
  0x99   : > { %s367_s6 = sand.u32 (!%p1542_p10), 1, %s1137_s22   ;;  %p1543_p5 = scmp.ne.s32.totalorder (!%p1542_p10), %s1528_s30, 0 }
  0x9a   : > { %795 = dma.hbm_to_vmem [thread:$0]  (!%p1541_p9), %s1511_s4, 256, %s354_s14, %s1324_s28, %s1152_s21, %s1152_s21, %s1153_s27  }
  0x9b   : > { %365 = sbr.rel (%p1542_p10) target bundleno = 237 (0xed), region = 40  ;;  %s1416_s16 = sshll.u32 (!%p1542_p10), %s367_s6, 4 }
  0x9c   : > { %s368_s29 = scalar_lea.sflag (!%p1542_p10), [#allocation4], %s367_s6  ;;  %s371_s12 = scalar_lea.vmem (!%p1542_p10), [#allocation3], %s1416_s16 }
  0xa2   : > { %1103 = dma.done.wait (%p1543_p5), %s368_s29, 256  }
  0xa3   : > { %1105 = vsyncadd (%p1543_p5), %s368_s29, 4294967040  ;;  %s376_s28 = sand.u32 1, %s1228_s26   ;;  %s380_s21 = scalar_lea.vmem [#allocation6], %s1416_s16 }
  0xa4   : > { %s377_s11 = scalar_lea.sflag [#allocation7], %s376_s28 }
  0xa5   : > { %1107 = dma.done.wait (%p1543_p5), %s377_s11, 512  }
  0xa6   : > { %1109 = vsyncadd (%p1543_p5), %s377_s11, 4294966784  ;;  %s389_s27 = scalar_lea.vmem [#allocation8], %s1416_s16  ;;  %s395_s13 = scalar_lea.sflag [#allocation10], %s376_s28 }
  0xa7   : > { %s398_s14 = scalar_lea.vmem [#allocation9], %s1416_s16 }
  0xa8   : > { %1111 = dma.done.wait (%p1543_p5), %s395_s13, 512  }
  0xa9   : > { %1113 = vsyncadd (%p1543_p5), %s395_s13, 4294966784  ;;  %v483_v0 = vld [vmem:[%s389_s27] sm:$0xff]  ;;  %v484_v1 = vld [vmem:[%s389_s27 + $0x8] sm:$0xff]  ;;  %v527_v10 = vlaneseq  ;;  %s758_s26 = sshll.u32 %s1141_s23, 4  ;;  %s407_s30 = scalar_lea.vmem [#allocation11], %s1416_s16 }
  0xaa   : > { %v499_v2 = vsub.f32 0.0, %v483_v0  ;;  %v500_v3 = vsub.f32 0.0, %v484_v1  ;;  %v485_v11 = vld [vmem:[%s398_s14] sm:$0xff]  ;;  %v486_v12 = vld [vmem:[%s398_s14 + $0x8] sm:$0xff]  ;;  %v534_v26 = vstv %s758_s26  ;;  %s451_s24 = sand.u32 1, %s1125_s19   ;;  %s760_s1 = sshll.u32 %s1141_s23, 7 }
  0xab   : > { %v489_v14 = vmul.f32 2.0, %v485_v11  ;;  %v528_v15 = vshrl.u32 %v527_v10, 7  ;;  %v481_v17 = vld [vmem:[%s380_s21] sm:$0xff]  ;;  %v490_v18 = vmul.f32 2.0, %v486_v12  ;;  %v482_v20 = vld [vmem:[%s380_s21 + $0x8] sm:$0xff]  ;;  %v531_v37 = vand.u32 127, %v527_v10  ;;  %s1454_s20 = scalar_lea.hbm %s1512_s5, %s760_s1 }
  0xac   : > { %v501_v4 = vmul.f32 1.442695, %v499_v2  ;;  %v503_v5 = vmul.f32 1.442695, %v500_v3  ;;  %v479_v27 = vld [vmem:[%s371_s12] sm:$0xff]  ;;  %v480_v29 = vld [vmem:[%s371_s12 + $0x8] sm:$0xff] }
  0xad   : > { %v491_v23 = vsub.f32 %v481_v17, %v489_v14  ;;  %v529_v25 = vadd.s32 8, %v528_v15  ;;  %v492_v28 = vsub.f32 %v482_v20, %v490_v18  ;;  %v535_v30 = vadd.s32 %v534_v26, %v528_v15  ;;  %v487_v36 = vld [vmem:[%s407_s30] sm:$0xff]  ;;  %v488_v39 = vld [vmem:[%s407_s30 + $0x8] sm:$0xff]  ;;  %s757_s17 = sshll.u32 %s451_s24, 3  ;;  %s555_s8 = scalar_lea.sflag [#allocation5], %s451_s24 }
  0xae   : > { %876 = vpow2.f32 %v501_v4  ;;  %v495_v32 = vmul.f32 5.0, %v479_v27  ;;  %v496_v35 = vmul.f32 5.0, %v480_v29  ;;  %v521_v43 = vsub.f32 1.0, %v487_v36  ;;  %s453_s18 = scalar_lea.vmem [#allocation12], %s757_s17  ;;  %p1544_p11 = scmp.ne.s32.totalorder %s1530_s9, 0 }
  0xaf   : > { %878 = vpow2.f32 %v503_v5  ;;  %v493_v31 = vmul.f32 %v491_v23, %v481_v17  ;;  %v536_v33 = vadd.s32 %v534_v26, %v529_v25  ;;  %v494_v34 = vmul.f32 %v492_v28, %v482_v20  ;;  %s568_s10 = sshll.u32 %s453_s18, 4  ;;  %s1158_s23 = smov [#allocation12]   ;;  %s1449_s10 = int_to_ptr.vmem [resolvable:$true] %s568_s10 }
  0xb0   : > { %v537_v38 = vmul.u32 128, %v535_v30  ;;  %v522_v45 = vsub.f32 1.0, %v488_v39  ;;  %s1038_s6 = scalar_lea.vmem %s1449_s10, 128  ;;  %s1042_s16 = sshll.u32 %s1158_s23, 4  ;;  %s1043_s16 = int_to_ptr.vmem [resolvable:$false] %s1042_s16 }
  0xb1   : > { %v497_v40 = vadd.f32 %v495_v32, %v493_v31  ;;  %v538_v41 = vmul.u32 128, %v536_v33  ;;  %v498_v42 = vadd.f32 %v496_v35, %v494_v34  ;;  %p1039_p8 = scmp.ne.s32.totalorder %s1449_s10, %s1038_s6  ;;  %s1044_s29 = scalar_lea.vmem %s1043_s16, 256 }
  0xb2   : > { %v539_v46 = vadd.s32 %v537_v38, %v531_v37  ;;  %p1045_p7 = scmp.lt.s32.totalorder %s1449_s10, %s1043_s16  ;;  %p1046_p13 = scmp.lt.s32.totalorder %s1044_s29, %s1038_s6 }
  0xb3   : > { %v519_v49 = vmul.f32 %v497_v40, %v487_v36  ;;  %v540_v50 = vadd.s32 %v538_v41, %v531_v37  ;;  %v520_v52 = vmul.f32 %v498_v42, %v488_v39  ;;  %p1040_p1 = pnand %p1039_p8, %p1544_p11 }
  0xb4   : > { %vm541_vm0 = vcmp.lt.s32.totalorder %v539_v46, 2048  ;;  %p1047_p12 = por %p1046_p13, %p1045_p7 }
  0xb5   : > { %vm542_vm1 = vcmp.lt.s32.totalorder %v540_v50, 2048  ;;  %p1041_p4 = pneg %p1040_p1 }
  0xb7   : > { %p1048_p0 = pnand %p1047_p12, %p1041_p4 }
  0xb8   : > { %v877_v6 = vpop.eup %876 }
  0xb9   : > { %v879_v7 = vpop.eup %878  ;;  %v505_v8 = vadd.f32 1.0, %v877_v6 }
  0xba   : > { %v506_v9 = vadd.f32 1.0, %v879_v7 }
  0xbb   : > { %880 = vrcp.f32 %v505_v8 }
  0xbc   : > { %882 = vrcp.f32 %v506_v9 }
  0xc5   : > { %v881_v13 = vpop.eup %880 }
  0xc6   : > { %v883_v16 = vpop.eup %882  ;;  %v511_v19 = vsub.f32 1.0, %v881_v13 }
  0xc7   : > { %v512_v21 = vsub.f32 1.0, %v883_v16 }
  0xc8   : > { %v513_v22 = vadd.f32 1e-08, %v511_v19 }
  0xc9   : > { %v514_v24 = vadd.f32 1e-08, %v512_v21 }
  0xca   : > { %884 = vlog2.f32 %v513_v22 }
  0xcb   : > { %886 = vlog2.f32 %v514_v24 }
  0xd4   : > { %v885_v44 = vpop.eup %884 }
  0xd5   : > { %v887_v47 = vpop.eup %886  ;;  %v516_v48 = vmul.f32 0.6931472, %v885_v44 }
  0xd6   : > { %v518_v51 = vmul.f32 0.6931472, %v887_v47 }
  0xd7   : > { %v523_v53 = vmul.f32 %v521_v43, %v516_v48 }
  0xd8   : > { %v524_v54 = vmul.f32 %v522_v45, %v518_v51 }
  0xd9   : > { %v525_v55 = vsub.f32 %v519_v49, %v523_v53 }
  0xda   : > { %v526_v56 = vsub.f32 %v520_v52, %v524_v54 }
  0xdb   : > { %v543_v57 = vsel %vm541_vm0, %v525_v55, 0.0 }
  0xdc   : > { %v544_v58 = vsel %vm542_vm1, %v526_v56, 0.0 }
  0xdd   : > { %v546_v59 = vadd.f32 %v544_v58, %v543_v57 }
  0xdf   : > { %553 = vst [vmem:[%s453_s18] sm:$0xff] %v546_v59 }
  0xe0   : > { %1051 = shalt.err (!%p1048_p0)
}
  0xe1   : > { %s1052_s12 = scalar_lea.hbm %s1454_s20, 128  ;;  %s1056_s21 = scalar_lea.hbm %s1512_s5, 256 }
  0xe2   : > { %p1053_p2 = scmp.ne.s32.totalorder %s1454_s20, %s1052_s12  ;;  %p1057_p9 = scmp.lt.u32.totalorder %s1454_s20, %s1512_s5 }
  0xe3   : > { %p1058_p10 = scmp.lt.u32.totalorder %s1056_s21, %s1052_s12  ;;  %p1060_p8 = scmp.lt.u32.totalorder %s1052_s12, %s1454_s20 }
  0xe4   : > { %p1054_p3 = pnand %p1053_p2, %p1544_p11 }
  0xe5   : > { %p1059_p5 = por %p1058_p10, %p1057_p9 }
  0xe6   : > { %p1055_p6 = pneg %p1054_p3 }
  0xe7   : > { %p1061_p1 = por %p1060_p8, %p1059_p5 }
  0xe9   : > { %p1062_p4 = pnand %p1061_p1, %p1055_p6 }
  0xeb   : > { %1065 = shalt.err (!%p1062_p4)
}
  0xec   : > { %778 = dma.vmem_to_hbm [thread:$0]  (%p1544_p11), %s1449_s10, 128, %s1454_s20, %s555_s8  }
  0xed PF: > { %s1545_s14 = sld [smem:[#allocation17_spill]]  ;;  %s1546_s26 = sld [smem:[#allocation22_spill]] }
  0xee   : > { %p1548_p13 = scmp.ge.s32.totalorder %s1149_s25, 2 }
  0xf3   : > { %s580_s30 = sand.u32 1, %s1545_s14   ;;  %p1547_p7 = scmp.ne.s32.totalorder %s1546_s26, 0 }
  0xf4   : > { %s581_s24 = scalar_lea.sflag [#allocation5], %s580_s30 }
  0xf5   : > { %p797_p12 = pnand %p1548_p13, %p1547_p7 }
  0xf7   : > { %1115 = dma.done.wait (!%p797_p12), %s581_s24, 128  }
  0xf8   : > { %1117 = vsyncadd (!%p797_p12), %s581_s24, 4294967168  ;;  %s27_s25 = sadd.s32 1, %s1149_s25   ;;  %s1549_s17 = sld [smem:[#allocation18_spill]] }
  0xf9   : > { %p24_p0 = scmp.ge.s32.totalorder %s27_s25, 4   ;;  %s1550_s20 = sld [smem:[#allocation21_spill]] }
  0xfa   : > { %s1551_s23 = sld [smem:[#allocation19_spill]]  ;;  %s1552_s24 = sld [smem:[#allocation20_spill]] }
  0xfb   : > { %s1553_s18 = smov %s1125_s19  ;;  %s1555_s21 = smov %s1137_s22 }
  0xfc   : > { %s1497_s22 = smov 0   ;;  %26 = sbr.rel (!%p24_p0) target bundleno = 13 (0xd), region = 141 }
  0xfe   : > { %s1554_s19 = smov %s1549_s17 }
 0x103   :  { %586 = vsyncpa [#allocation4], 1 }
 0x104   :  { %588 = vsyncpa [#allocation4 + $0x1], 1 }
 0x105   :  { %589 = vsyncpa [#allocation7], 1 }
 0x106   :  { %591 = vsyncpa [#allocation7 + $0x1], 1 }
 0x107   :  { %592 = vsyncpa [#allocation10], 1 }
 0x108   :  { %594 = vsyncpa [#allocation10 + $0x1], 1 }
 0x109   :  { %595 = vsyncpa [#allocation5], 1 }
 0x10a   :  { %597 = vsyncpa [#allocation5 + $0x1], 1 }

</bundles_post_ra>
